<compile_context>
chip_gen: v6e
topology: v6e:2x2x1
jax: 0.10.0
libtpu: 0.0.40
codegen_flags: <defaults>
</compile_context>

<pallas_src>
import jax
import jax.numpy as jnp
from jax.experimental import pallas as pl
from jax.experimental.pallas import tpu as pltpu


def _awl_kernel(p_ref, l_ref, out_ref):
    # p_ref, l_ref: (1, num) f32 in VMEM.  out_ref: (1,) f32 in SMEM.
    p = p_ref[...]                         # (1, num)
    l = l_ref[...]                         # (1, num)
    p2 = p * p
    # 0.5 / p^2 * loss + log(1 + p^2), reduced over tasks.
    term = 0.5 * l / p2 + jnp.log1p(p2)    # exact f32 divide (rtol=1e-5 safe)
    out_ref[0] = jnp.sum(term)             # scalar result straight into SMEM


def _awl_pallas(params_row, losses_row):
    """params_row, losses_row: (1, num) f32 arrays already in the right dtype."""
    num = params_row.shape[1]
    out = pl.pallas_call(
        _awl_kernel,
        out_shape=jax.ShapeDtypeStruct((1,), jnp.float32),
        in_specs=[
            pl.BlockSpec(memory_space=pltpu.MemorySpace.VMEM),
            pl.BlockSpec(memory_space=pltpu.MemorySpace.VMEM),
        ],
        out_specs=pl.BlockSpec(memory_space=pltpu.MemorySpace.SMEM),
        cost_estimate=pl.CostEstimate(
            flops=7 * num,
            transcendentals=num,
            bytes_accessed=8 * num + 4,
        ),
    )(params_row, losses_row)
    return out[0]


@jax.jit
def automatic_weighted_loss(params, *losses):
    """params: (num,) f32; losses: num scalars, or a single (num,) array.

    Returns a scalar f32 equal to
        sum_i 0.5 / params[i]^2 * loss_i + log(1 + params[i]^2)
    matching AutomaticWeightedLoss.forward.
    """
    num = params.shape[0]
    if len(losses) == 1 and jnp.ndim(losses[0]) == 1:
        losses_vec = jnp.asarray(losses[0], jnp.float32)
    else:
        assert len(losses) == num, "number of losses must equal number of params"
        losses_vec = jnp.stack(
            [jnp.asarray(x, jnp.float32) for x in losses])

    p_row = params.astype(jnp.float32).reshape(1, num)
    l_row = losses_vec.reshape(1, num)
    return _awl_pallas(p_row, l_row)


if __name__ == "__main__":
    num = 2
    # Deterministic parameter init, matching torch.ones(num).
    params = jnp.ones((num,), dtype=jnp.float32)

    # Deterministic example per-task losses (scalars), as forward(*x) expects.
    key = jax.random.PRNGKey(0)
    k1, k2 = jax.random.split(key)
    loss1 = jnp.abs(jax.random.normal(k1, ())) + 0.5
    loss2 = jnp.abs(jax.random.normal(k2, ())) + 0.5

    result = automatic_weighted_loss(params, loss1, loss2)
    result = jax.block_until_ready(result)

    # Pure-JAX reference check (same formula as the PyTorch module).
    p2 = params.astype(jnp.float32) ** 2
    losses = jnp.stack([loss1, loss2]).astype(jnp.float32)
    ref = jnp.sum(0.5 / p2 * losses + jnp.log(1.0 + p2))
    assert jnp.allclose(result, ref, rtol=1e-5, atol=1e-5), (result, ref)

    print("KERNEL_OK")
</pallas_src>

<mosaic_0001>
module attributes {stable_mosaic.version = 11 : i64} {
  func.func @_awl_kernel(%arg0: memref<1x2xf32, #tpu.memory_space<vmem>>, %arg1: memref<1x2xf32, #tpu.memory_space<vmem>>, %arg2: memref<1xf32, #tpu.memory_space<smem>>) attributes {dimension_semantics = [], scalar_prefetch = 0 : i64, scratch_operands = 0 : i64, tpu.core_type = #tpu.core_type<tc>} {
    %c0 = arith.constant 0 : index
    %c0_0 = arith.constant 0 : index
    %0 = vector.load %arg0[%c0, %c0_0] : memref<1x2xf32, #tpu.memory_space<vmem>>, vector<1x2xf32>
    %c0_1 = arith.constant 0 : index
    %c0_2 = arith.constant 0 : index
    %1 = vector.load %arg1[%c0_1, %c0_2] : memref<1x2xf32, #tpu.memory_space<vmem>>, vector<1x2xf32>
    %2 = arith.mulf %0, %0 : vector<1x2xf32>
    %cst = arith.constant 5.000000e-01 : f32
    %3 = vector.broadcast %cst : f32 to vector<1x2xf32>
    %4 = arith.mulf %3, %1 : vector<1x2xf32>
    %5 = arith.divf %4, %2 : vector<1x2xf32>
    %6 = math.log1p %2 : vector<1x2xf32>
    %7 = arith.addf %5, %6 : vector<1x2xf32>
    %8 = vector.shape_cast %7 : vector<1x2xf32> to vector<1x1x2xf32>
    %cst_3 = arith.constant dense<0.000000e+00> : vector<1xf32>
    %9 = vector.multi_reduction <add>, %8, %cst_3 [1, 2] : vector<1x1x2xf32> to vector<1xf32>
    %10 = vector.shape_cast %9 : vector<1xf32> to vector<1x1x1xf32>
    %11 = vector.extract %10[0, 0, 0] : f32 from vector<1x1x1xf32>
    %c0_4 = arith.constant 0 : index
    %12 = memref.load %arg2[%c0_4] : memref<1xf32, #tpu.memory_space<smem>>
    memref.store %11, %arg2[%c0_4] : memref<1xf32, #tpu.memory_space<smem>>
    return
  }
}

</mosaic_0001>

<bundles_post_ra>
// kernel: automatic_weighted_loss.1
= control target key start
LH: loop header
LB: loop body
LE: loop exit
PB: predicated region body
PF: predicated region fallthrough
CT: control target
= control target key end

     0   :  { %s96_s0 = inlined_call_operand.vmem [shape: f32[1,2], index: 0, kind: input, shape index: {}]   ;;  %s97_s1 = inlined_call_operand.vmem [shape: f32[1,2], index: 1, kind: input, shape index: {}]   ;;  %s98_s2 = inlined_call_operand.hbm [shape: f32[1], index: 2, kind: output, shape index: {}]  }
   0x1   :  { %v12_v0 = vld [vmem:[%s96_s0] sm:$0x1] }
   0x2   :  { %v14_v1 = vmul.f32 %v12_v0, %v12_v0 }
   0x3   :  { %7 = vsyncpa [#allocation3], 0  ;;  %v13_v4 = vld [vmem:[%s97_s1] sm:$0x1]  ;;  %vm28_vm1 = vcmask 8192   ;;  %s71_s1 = smov [#allocation2]  }
   0x4   :  { %57 = vrcp.f32 %v14_v1  ;;  %v18_v2 = vadd.f32 1.0, %v14_v1  ;;  %v21_v3 = vmul.f32 -0.5, %v14_v1  ;;  %v15_v6 = vmul.f32 0.5, %v13_v4 }
   0x5   :  { %v24_v7 = vand.u32 2147483647, %v14_v1 }
   0x6   :  { %59 = vlog2.f32 %v18_v2  ;;  %v22_v5 = vadd.f32 1.0, %v21_v3 }
   0x7   :  { %vm25_vm0 = vcmp.lt.f32.partialorder %v24_v7, 0.0004427343 }
   0x8   :  { %v23_v9 = vmul.f32 %v22_v5, %v14_v1 }
  0x11   :  { %v58_v8 = vpop.eup %57 }
  0x12   :  { %v17_v11 = vmul.f32 %v58_v8, %v15_v6 }
  0x13   :  { %v60_v10 = vpop.eup %59 }
  0x14   :  { %v20_v12 = vmul.f32 0.6931472, %v60_v10 }
  0x16   :  { %v26_v13 = vsel %vm25_vm0, %v23_v9, %v20_v12 }
  0x17   :  { %v27_v14 = vadd.f32 %v26_v13, %v17_v11 }
  0x19   :  { %v29_v15 = vsel %vm28_vm1, %v27_v14, 0.0 }
  0x1a   :  { %30 = vadd.xlane.f32.xlu0 %v29_v15 }
  0xa3   :  { %v31_v16 = vpop.xlane.xlu0 %30 }
  0xa4   :  { %v32_v17 = vrot.slane %v31_v16, 4 }
  0xa6   :  { %v33_v18 = vadd.f32 %v32_v17, %v31_v16 }
  0xa8   :  { %v34_v19 = vrot.slane %v33_v18, 2 }
  0xaa   :  { %v35_v20 = vadd.f32 %v34_v19, %v33_v18 }
  0xac   :  { %v36_v21 = vrot.slane %v35_v20, 1 }
  0xae   :  { %v37_v22 = vadd.f32 %v36_v21, %v35_v20 }
  0xb0   :  { %54 = vpush %v37_v22 }
  0xe1   :  { %s55_s0 = spop %54 }
  0xe2   :  { %40 = sst [smem:[#allocation2]] %s55_s0 }
  0xe3   :  { %48 = dma.smem_to_hbm %s71_s1, 16, %s98_s2, [#allocation3]  }
  0xe4   :  { %69 = dma.done.wait [#allocation3], 16  }
  0xe5   :  { %70 = vsyncadd [#allocation3], 4294967280 }
  0xe6   :  { %52 = sfence }
  0xe7   :  { %53 = vsyncpa [#allocation3], 1 }

</bundles_post_ra>
